<compile_context>
chip_gen: v7x
topology: tpu7x:2x2x1
jax: 0.10.0
libtpu: 0.0.40
codegen_flags: <defaults>
</compile_context>

<pallas_src>
import jax
import jax.numpy as jnp
from jax.experimental import pallas as pl
from jax.experimental.pallas import tpu as pltpu


def _round_up(n, m):
    return ((n + m - 1) // m) * m


# -----------------------------------------------------------------------------
# Kernel
# -----------------------------------------------------------------------------
def _cas_external_memory_kernel(
    x_ref,    # [tb, in_features]           compute dtype (bf16)
    wqm_ref,  # [in_features, num_slots]    compute dtype  (= Wq @ M^T)
    bqm_ref,  # [1, num_slots]              f32            (= bq @ M^T)
    wx_ref,   # [in_features, out_pad]      compute dtype
    wmm_ref,  # [num_slots, out_pad]        compute dtype  (= M @ Wm)
    b_ref,    # [1, out_pad]                f32
    out_ref,  # [tb, out_pad]               f32
):
    x = x_ref[...]

    # External-memory attention read with the constant matmuls folded into the
    # weights:  scores = x @ (Wq M^T) + (bq M^T)
    scores = jnp.dot(x, wqm_ref[...], preferred_element_type=jnp.float32)
    scores = scores + bqm_ref[...]
    scores = scores - jnp.max(scores, axis=-1, keepdims=True)
    p = jnp.exp(scores)
    # Approx reciprocal runs on the EUP slot (essentially free); its ~1e-3
    # relative error is below the bf16 matmul-input noise floor.
    attn = p * pl.reciprocal(jnp.sum(p, axis=-1, keepdims=True), approx=True)

    # concat([x, mem_repr]) @ W_lin + b  fused as  x @ Wx + attn @ (M Wm) + b
    out = (
        jnp.dot(x, wx_ref[...], preferred_element_type=jnp.float32)
        + jnp.dot(attn.astype(wmm_ref.dtype), wmm_ref[...],
                  preferred_element_type=jnp.float32)
        + b_ref[...]
    )
    out_ref[...] = out.astype(out_ref.dtype)


# -----------------------------------------------------------------------------
# One-time parameter preparation (hoisted out of the per-call hot path)
# -----------------------------------------------------------------------------
def prepare_cas_params(wq, bq, memory, wx, wm, b, *, compute_dtype=jnp.bfloat16):
    """Fold constant matmuls into the weights, lane-pad, and cast for the MXU."""
    in_features, hidden = wq.shape
    num_slots = memory.shape[0]
    out_features = wx.shape[1]

    f32 = jnp.float32
    mem = jnp.asarray(memory, f32)
    # Exact algebraic folds (done once, in f32).
    wqm = jnp.asarray(wq, f32) @ mem.T          # [in_features, num_slots]
    bqm = jnp.asarray(bq, f32) @ mem.T          # [1, num_slots]
    wmm = mem @ jnp.asarray(wm, f32)            # [num_slots, out_features]

    # Lane-dense output padding: 128 minimum; prefer a 256-multiple (v6e/v7x
    # MXU is 256 lanes wide) when the extra padding is modest.  v5e (128x128
    # MXU) is fine at 128.
    out_pad128 = _round_up(max(out_features, 128), 128)
    out_pad256 = _round_up(max(out_features, 256), 256)
    out_pad = out_pad256 if out_pad256 <= out_pad128 + max(out_features // 4, 0) \
        else out_pad128

    def pad_cols(a):
        if a.shape[1] == out_pad:
            return a
        return jnp.zeros((a.shape[0], out_pad), a.dtype).at[:, : a.shape[1]].set(a)

    params = {
        # bf16 MXU inputs (weights); biases stay f32 (added post-accumulation).
        "wqm": wqm.astype(compute_dtype),
        "bqm": bqm.astype(f32),
        "wx": pad_cols(jnp.asarray(wx, f32)).astype(compute_dtype),
        "wmm": pad_cols(wmm).astype(compute_dtype),
        "b": pad_cols(jnp.asarray(b, f32)).astype(f32),
        "out_features": out_features,
        "compute_dtype": compute_dtype,
    }
    return params


# -----------------------------------------------------------------------------
# Wrapper
# -----------------------------------------------------------------------------
def cas_external_memory(x, params, *, batch_tile=512, return_padded=False):
    B, in_features = x.shape
    wqm, bqm = params["wqm"], params["bqm"]
    wx, wmm, b = params["wx"], params["wmm"], params["b"]
    out_features = params["out_features"]
    compute_dtype = params["compute_dtype"]

    num_slots = wqm.shape[1]
    out_pad = wx.shape[1]
    dtype_bytes = wqm.dtype.itemsize

    # x is cast once here so the streamed tile DMAs are bf16-sized.
    # (Ideally the upstream producer already supplies compute_dtype.)
    x_c = x if x.dtype == compute_dtype else x.astype(compute_dtype)

    # ---- generation-aware VMEM budget & batch tile --------------------------
    try:
        vmem_cap = pltpu.get_tpu_info().vmem_capacity_bytes
    except Exception:
        vmem_cap = 64 * 1024 * 1024  # conservative fallback (v7x per-core VMEM)
    vmem_budget = int(0.75 * vmem_cap)     # ~96 MiB on v5e/v6e, ~48 MiB on v7x

    weight_bytes = sum(a.size * a.dtype.itemsize for a in (wqm, bqm, wx, wmm, b))
    # Double-buffered streamed tiles: x (compute dtype) + out (f32), per row.
    per_row_stream = 2 * (in_features * dtype_bytes + out_pad * 4)
    avail = max(vmem_budget - 2 * weight_bytes, 8 * per_row_stream)
    tb_max = max(8, (avail // per_row_stream) // 8 * 8)

    tb = min(batch_tile, tb_max)
    # Keep the batch grid >= 2 steps where possible so ("parallel",) can shard
    # the grid across v7x's two TensorCores.
    tb = min(tb, _round_up(pl.cdiv(B, 2), 8))
    tb = max(8, min(tb, _round_up(B, 8)))

    grid = (pl.cdiv(B, tb),)  # last batch block may be partial; Pallas masks it

    # ---- specs ---------------------------------------------------------------
    x_spec = pl.BlockSpec((tb, in_features), lambda i: (i, 0))
    out_spec = pl.BlockSpec((tb, out_pad), lambda i: (i, 0))

    def const_spec(shape):
        # Constant index_map -> fetched once, VMEM-resident across the grid.
        # Single-buffered: no need to reserve a second pipeline buffer.
        return pl.BlockSpec(shape, lambda i: (0, 0), pipeline_mode=pl.Buffered(1))

    # ---- cost estimate (post-fold algebra) -----------------------------------
    flops = 2 * B * (
        in_features * num_slots      # x @ Wqm
        + in_features * out_pad      # x @ Wx
        + num_slots * out_pad        # attn @ Wmm
    )
    transcendentals = B * num_slots  # exp in softmax
    bytes_accessed = (
        B * in_features * dtype_bytes
        + weight_bytes
        + B * out_pad * 4
    )

    out = pl.pallas_call(
        _cas_external_memory_kernel,
        out_shape=jax.ShapeDtypeStruct((B, out_pad), jnp.float32),
        grid=grid,
        in_specs=[
            x_spec,
            const_spec(wqm.shape),
            const_spec(bqm.shape),
            const_spec(wx.shape),
            const_spec(wmm.shape),
            const_spec(b.shape),
        ],
        out_specs=out_spec,
        compiler_params=pltpu.CompilerParams(
            dimension_semantics=("parallel",),
            vmem_limit_bytes=vmem_budget,
        ),
        cost_estimate=pl.CostEstimate(
            flops=flops,
            transcendentals=transcendentals,
            bytes_accessed=bytes_accessed,
        ),
    )(x_c, wqm, bqm, wx, wmm, b)

    if return_padded:
        return out                       # lane-padded slab, no extra HBM pass
    return out[:, :out_features]


# -----------------------------------------------------------------------------
# Pure-JAX reference (unfolded, f32) and test
# -----------------------------------------------------------------------------
def reference(x, wq, bq, memory, wx, wm, b):
    q = x @ wq + bq
    scores = q @ memory.T
    attn = jax.nn.softmax(scores, axis=-1)
    mem_repr = attn @ memory
    return x @ wx + mem_repr @ wm + b


if __name__ == "__main__":
    # Small shapes consistent with the module's forward.
    B = 8
    in_features = 16
    hidden_dim = 32
    out_features = 8
    num_slots = 16

    key = jax.random.PRNGKey(0)
    k = jax.random.split(key, 7)
    x = jax.random.normal(k[0], (B, in_features), dtype=jnp.float32)

    # Deterministic parameter init (synthetic; no checkpoint load).
    wq = jax.random.normal(k[1], (in_features, hidden_dim), dtype=jnp.float32) * 0.1
    bq = jax.random.normal(k[2], (1, hidden_dim), dtype=jnp.float32) * 0.1
    memory = jax.random.normal(k[3], (num_slots, hidden_dim), dtype=jnp.float32) * 0.1
    # lin: Linear(in_features + hidden_dim, out_features), split into the block
    # acting on x and the block acting on the memory representation.
    wx = jax.random.normal(k[4], (in_features, out_features), dtype=jnp.float32) * 0.1
    wm = jax.random.normal(k[5], (hidden_dim, out_features), dtype=jnp.float32) * 0.1
    b = jax.random.normal(k[6], (1, out_features), dtype=jnp.float32) * 0.1

    # One-time parameter preparation (fold + pad + bf16 cast).
    params = jax.block_until_ready(
        prepare_cas_params(wq, bq, memory, wx, wm, b, compute_dtype=jnp.bfloat16)
    )

    out = cas_external_memory(x, params)
    out = jax.block_until_ready(out)

    ref = reference(x, wq, bq, memory, wx, wm, b)
    assert out.shape == (B, out_features)
    # bf16 MXU inputs + approx softmax reciprocal -> loose tolerance vs f32 ref.
    assert jnp.allclose(out, ref, atol=2e-2, rtol=2e-2), "mismatch vs reference"
    print("KERNEL_OK")
</pallas_src>

<mosaic_0001>
module attributes {stable_mosaic.version = 11 : i64} {
  func.func @_cas_external_memory_kernel(%arg0: i32, %arg1: memref<8x16xbf16, #tpu.memory_space<vmem>>, %arg2: memref<16x16xbf16, #tpu.memory_space<vmem>>, %arg3: memref<1x16xf32, #tpu.memory_space<vmem>>, %arg4: memref<16x128xbf16, #tpu.memory_space<vmem>>, %arg5: memref<16x128xbf16, #tpu.memory_space<vmem>>, %arg6: memref<1x128xf32, #tpu.memory_space<vmem>>, %arg7: memref<8x128xf32, #tpu.memory_space<vmem>>) attributes {dimension_semantics = [#tpu.dimension_semantics<parallel>], iteration_bounds = array<i64: 1>, scalar_prefetch = 0 : i64, scratch_operands = 0 : i64, tpu.core_type = #tpu.core_type<tc>, window_params = [{transform_indices = @transform_0, window_bounds = array<i64: 8, 16>}, {pipeline_mode = #tpu.pipeline_mode<synchronous>, transform_indices = @transform_1, window_bounds = array<i64: 16, 16>}, {pipeline_mode = #tpu.pipeline_mode<synchronous>, transform_indices = @transform_2, window_bounds = array<i64: 1, 16>}, {pipeline_mode = #tpu.pipeline_mode<synchronous>, transform_indices = @transform_3, window_bounds = array<i64: 16, 128>}, {pipeline_mode = #tpu.pipeline_mode<synchronous>, transform_indices = @transform_4, window_bounds = array<i64: 16, 128>}, {pipeline_mode = #tpu.pipeline_mode<synchronous>, transform_indices = @transform_5, window_bounds = array<i64: 1, 128>}, {transform_indices = @transform_6, window_bounds = array<i64: 8, 128>}]} {
    %c0 = arith.constant 0 : index
    %c0_0 = arith.constant 0 : index
    %0 = vector.load %arg1[%c0, %c0_0] : memref<8x16xbf16, #tpu.memory_space<vmem>>, vector<8x16xbf16>
    %c0_1 = arith.constant 0 : index
    %c0_2 = arith.constant 0 : index
    %1 = vector.load %arg2[%c0_1, %c0_2] : memref<16x16xbf16, #tpu.memory_space<vmem>>, vector<16x16xbf16>
    %cst = arith.constant dense<0.000000e+00> : vector<8x16xf32>
    %2 = tpu.matmul %0, %1, %cst {dimension_numbers = #tpu.dot_dimension_numbers<[1], [0], [0], [1], [0, 0, 1, 1], [], []>} : vector<8x16xbf16>, vector<16x16xbf16>, vector<8x16xf32> -> vector<8x16xf32>
    %c0_3 = arith.constant 0 : index
    %c0_4 = arith.constant 0 : index
    %3 = vector.load %arg3[%c0_3, %c0_4] : memref<1x16xf32, #tpu.memory_space<vmem>>, vector<1x16xf32>
    %4 = vector.broadcast %3 : vector<1x16xf32> to vector<8x16xf32>
    %5 = arith.addf %2, %4 : vector<8x16xf32>
    %cst_5 = arith.constant dense<0xFF800000> : vector<8xf32>
    %6 = vector.multi_reduction <maximumf>, %5, %cst_5 [1] : vector<8x16xf32> to vector<8xf32>
    %7 = vector.shape_cast %6 : vector<8xf32> to vector<8x1xf32>
    %8 = vector.broadcast %7 : vector<8x1xf32> to vector<8x16xf32>
    %9 = arith.subf %5, %8 : vector<8x16xf32>
    %10 = math.exp %9 : vector<8x16xf32>
    %cst_6 = arith.constant dense<0.000000e+00> : vector<8xf32>
    %11 = vector.multi_reduction <add>, %10, %cst_6 [1] : vector<8x16xf32> to vector<8xf32>
    %12 = vector.shape_cast %11 : vector<8xf32> to vector<8x1xf32>
    %13 = tpu.reciprocal %12 {approx = true} : vector<8x1xf32> -> vector<8x1xf32>
    %14 = vector.broadcast %13 : vector<8x1xf32> to vector<8x16xf32>
    %15 = arith.mulf %10, %14 : vector<8x16xf32>
    %c0_7 = arith.constant 0 : index
    %c0_8 = arith.constant 0 : index
    %16 = vector.load %arg4[%c0_7, %c0_8] : memref<16x128xbf16, #tpu.memory_space<vmem>>, vector<16x128xbf16>
    %cst_9 = arith.constant dense<0.000000e+00> : vector<8x128xf32>
    %17 = tpu.matmul %0, %16, %cst_9 {dimension_numbers = #tpu.dot_dimension_numbers<[1], [0], [0], [1], [0, 0, 1, 1], [], []>} : vector<8x16xbf16>, vector<16x128xbf16>, vector<8x128xf32> -> vector<8x128xf32>
    %18 = arith.truncf %15 : vector<8x16xf32> to vector<8x16xbf16>
    %c0_10 = arith.constant 0 : index
    %c0_11 = arith.constant 0 : index
    %19 = vector.load %arg5[%c0_10, %c0_11] : memref<16x128xbf16, #tpu.memory_space<vmem>>, vector<16x128xbf16>
    %cst_12 = arith.constant dense<0.000000e+00> : vector<8x128xf32>
    %20 = tpu.matmul %18, %19, %cst_12 {dimension_numbers = #tpu.dot_dimension_numbers<[1], [0], [0], [1], [0, 0, 1, 1], [], []>} : vector<8x16xbf16>, vector<16x128xbf16>, vector<8x128xf32> -> vector<8x128xf32>
    %21 = arith.addf %17, %20 : vector<8x128xf32>
    %c0_13 = arith.constant 0 : index
    %c0_14 = arith.constant 0 : index
    %22 = vector.load %arg6[%c0_13, %c0_14] : memref<1x128xf32, #tpu.memory_space<vmem>>, vector<1x128xf32>
    %23 = vector.broadcast %22 : vector<1x128xf32> to vector<8x128xf32>
    %24 = arith.addf %21, %23 : vector<8x128xf32>
    %c0_15 = arith.constant 0 : index
    %c0_16 = arith.constant 0 : index
    %25 = vector.load %arg7[%c0_15, %c0_16] : memref<8x128xf32, #tpu.memory_space<vmem>>, vector<8x128xf32>
    tpu.vector_store %arg7[%c0_15, %c0_16], %24 {strides = array<i32>} : memref<8x128xf32, #tpu.memory_space<vmem>>, vector<8x128xf32>,
    return
  }
  func.func @transform_0(%arg0: i32) -> (i32, i32) {
    %c0_i32 = arith.constant 0 : i32
    %c0_i32_0 = arith.constant 0 : i32
    return %arg0, %c0_i32 : i32, i32
  }
  func.func @transform_1(%arg0: i32) -> (i32, i32) {
    %c0_i32 = arith.constant 0 : i32
    %c0_i32_0 = arith.constant 0 : i32
    %c0_i32_1 = arith.constant 0 : i32
    return %c0_i32, %c0_i32_0 : i32, i32
  }
  func.func @transform_2(%arg0: i32) -> (i32, i32) {
    %c0_i32 = arith.constant 0 : i32
    %c0_i32_0 = arith.constant 0 : i32
    %c0_i32_1 = arith.constant 0 : i32
    return %c0_i32, %c0_i32_0 : i32, i32
  }
  func.func @transform_3(%arg0: i32) -> (i32, i32) {
    %c0_i32 = arith.constant 0 : i32
    %c0_i32_0 = arith.constant 0 : i32
    %c0_i32_1 = arith.constant 0 : i32
    return %c0_i32, %c0_i32_0 : i32, i32
  }
  func.func @transform_4(%arg0: i32) -> (i32, i32) {
    %c0_i32 = arith.constant 0 : i32
    %c0_i32_0 = arith.constant 0 : i32
    %c0_i32_1 = arith.constant 0 : i32
    return %c0_i32, %c0_i32_0 : i32, i32
  }
  func.func @transform_5(%arg0: i32) -> (i32, i32) {
    %c0_i32 = arith.constant 0 : i32
    %c0_i32_0 = arith.constant 0 : i32
    %c0_i32_1 = arith.constant 0 : i32
    return %c0_i32, %c0_i32_0 : i32, i32
  }
  func.func @transform_6(%arg0: i32) -> (i32, i32) {
    %c0_i32 = arith.constant 0 : i32
    %c0_i32_0 = arith.constant 0 : i32
    return %arg0, %c0_i32 : i32, i32
  }
}

</mosaic_0001>

<bundles_post_ra>
// kernel: tpu_custom_call.1
= control target key start
LH: loop header
LB: loop body
LE: loop exit
PB: predicated region body
PF: predicated region fallthrough
CT: control target
= control target key end

     0   :  { %11 = vsyncpa [#allocation3], 0  ;;  %s512_s0 = inlined_call_operand.hbm [shape: bf16[8,16], index: 0, kind: input, shape index: {}]   ;;  %s513_s1 = inlined_call_operand.hbm [shape: bf16[16,16], index: 1, kind: input, shape index: {}]   ;;  %s514_s2 = inlined_call_operand.vmem [shape: f32[1,16], index: 2, kind: input, shape index: {}]   ;;  %s515_s3 = inlined_call_operand.vmem [shape: bf16[16,128], index: 3, kind: input, shape index: {}]   ;;  %s516_s4 = inlined_call_operand.hbm [shape: bf16[16,128], index: 4, kind: input, shape index: {}]   ;;  %s517_s5 = inlined_call_operand.vmem [shape: f32[1,128], index: 5, kind: input, shape index: {}]   ;;  %s518_s6 = inlined_call_operand.hbm [shape: f32[8,128], index: 6, kind: output, shape index: {}]  }
   0x1   :  { %12 = vsyncpa [#allocation6], 0 }
   0x2   :  { %13 = vsyncpa [#allocation4], 0  ;;  %s401_s21 = smov [#allocation5]   ;;  %s307_s25 = scalar_lea.hbm %s513_s1, 128 }
   0x3   :  { %s29_s22 = sshll.u32 %s401_s21, 4  ;;  %p308_p0 = scmp.ne.s32.totalorder %s513_s1, %s307_s25  ;;  %s30_s22 = int_to_ptr.vmem [resolvable:$true] %s29_s22 }
   0x4   :  { %p311_p1 = scmp.lt.u32.totalorder %s307_s25, %s513_s1 }
   0x6   :  { %p313_p2 = pnand %p311_p1, %p308_p0 }
   0x8   :  { %316 = shalt.err (!%p313_p2)
}
   0x9   :  { %s317_s30 = scalar_lea.vmem %s30_s22, 128  ;;  %p322_p4 = scmp.lt.s32.totalorder %s30_s22, %s30_s22 }
   0xa   :  { %p318_p3 = scmp.ne.s32.totalorder %s30_s22, %s317_s30  ;;  %p323_p5 = scmp.lt.s32.totalorder %s317_s30, %s317_s30 }
   0xc   :  { %p324_p6 = por %p323_p5, %p322_p4 }
   0xe   :  { %p325_p7 = pnand %p324_p6, %p318_p3 }
  0x10   :  { %328 = shalt.err (!%p325_p7)
}
  0x11   :  { %s402_s7 = smov 64   ;;  %s403_s8 = smov 4  }
  0x12   :  { %35 = dma.hbm_to_vmem [thread:$0]  %s513_s1, 128, %s30_s22, [#allocation6], %s402_s7, %s402_s7, %s403_s8  }
  0x13   :  { %s404_s11 = smov [#allocation2]   ;;  %s405_s13 = smov [#allocation7]  }
  0x14   :  { %s20_s12 = sshll.u32 %s404_s11, 4  ;;  %s45_s14 = sshll.u32 %s405_s13, 4  ;;  %s21_s12 = int_to_ptr.vmem [resolvable:$true] %s20_s12  ;;  %s46_s14 = int_to_ptr.vmem [resolvable:$true] %s45_s14 }
  0x15   :  { %s329_s17 = scalar_lea.hbm %s512_s0, 64 }
  0x16   :  { %p330_p8 = scmp.ne.s32.totalorder %s512_s0, %s329_s17  ;;  %p333_p9 = scmp.lt.u32.totalorder %s329_s17, %s512_s0 }
  0x18   :  { %p335_p10 = pnand %p333_p9, %p330_p8 }
  0x1a   :  { %338 = shalt.err (!%p335_p10)
}
  0x1b   :  { %s339_s1 = scalar_lea.vmem %s21_s12, 64  ;;  %p344_p12 = scmp.lt.s32.totalorder %s21_s12, %s21_s12 }
  0x1c   :  { %p340_p11 = scmp.ne.s32.totalorder %s21_s12, %s339_s1  ;;  %p345_p13 = scmp.lt.s32.totalorder %s339_s1, %s339_s1 }
  0x1e   :  { %p346_p0 = por %p345_p13, %p344_p12 }
  0x20   :  { %p347_p1 = pnand %p346_p0, %p340_p11 }
  0x22   :  { %350 = shalt.err (!%p347_p1)
}
  0x23   :  { %23 = dma.hbm_to_vmem [thread:$0]  %s512_s0, 64, %s21_s12, [#allocation3]  }
  0x24   :  { %s351_s26 = scalar_lea.hbm %s516_s4, 128 }
  0x25   :  { %p352_p2 = scmp.ne.s32.totalorder %s516_s4, %s351_s26  ;;  %p355_p3 = scmp.lt.u32.totalorder %s351_s26, %s516_s4 }
  0x27   :  { %p357_p4 = pnand %p355_p3, %p352_p2 }
  0x29   :  { %360 = shalt.err (!%p357_p4)
}
  0x2a   :  { %s361_s9 = scalar_lea.vmem %s46_s14, 128  ;;  %p366_p6 = scmp.lt.s32.totalorder %s46_s14, %s46_s14 }
  0x2b   :  { %p362_p5 = scmp.ne.s32.totalorder %s46_s14, %s361_s9  ;;  %p367_p7 = scmp.lt.s32.totalorder %s361_s9, %s361_s9 }
  0x2d   :  { %p368_p8 = por %p367_p7, %p366_p6 }
  0x2f   :  { %p369_p9 = pnand %p368_p8, %p362_p5 }
  0x31   :  { %372 = shalt.err (!%p369_p9)
}
  0x32   :  { %51 = dma.hbm_to_vmem [thread:$0]  %s516_s4, 128, %s46_s14, [#allocation6], %s402_s7, %s402_s7, %s403_s8  }
  0x33   :  { %395 = dma.done.wait [#allocation3], 64  }
  0x34   :  { %396 = vsyncadd [#allocation3], 4294967232 }
  0x35   :  { %397 = dma.done.wait [#allocation6], 256  }
  0x36   :  { %398 = vsyncadd [#allocation6], 4294967040  ;;  %v406_v0 = vmov 0.0   ;;  %vm407_vm0 = vmmov 0   ;;  %v300_v1 = vld [vmem:[#allocation5] sm:$0xff]   ;;  %vm80_vm1 = vcmask 130048  }
  0x37   :  { %274 = vmatprep.subr.bf16.mxu0 %v406_v0  ;;  %276 = vmatprep.mubr.msk.bf16.mxu0 %vm407_vm0, %v406_v0  ;;  %v64_v2 = vld [vmem:[#allocation2] sm:$0xf]  ;;  %v260_v3 = vld [vmem:[%s514_s2] ss:$0 sm:$0xff]  ;;  %v302_v16 = vld [vmem:[#allocation7] sm:$0xff]  }
  0x38   :  { %280 = vmatprep.subr.bf16.mxu1 %v406_v0  ;;  %282 = vmatprep.mubr.msk.bf16.mxu1 %vm407_vm0, %v406_v0  ;;  %v301_v15 = vld [vmem:[%s515_s3] sm:$0xff]   ;;  %s408_s3 = smov [#allocation8]  }
  0x39   :  { %275 = vmatpush3.bf16.msra.mxu0 %v300_v1  ;;  %281 = vmatpush3.bf16.msra.mxu1 %v302_v16  ;;  %v267_v26 = vld [vmem:[%s517_s5] ss:$0 sm:$0xff]  ;;  %s250_s13 = sshll.u32 %s408_s3, 4  ;;  %s251_s13 = int_to_ptr.vmem [resolvable:$true] %s250_s13 }
  0x3a   :  { %286 = vmatprep.subr.bf16.mxu0 %v406_v0  ;;  %s373_s14 = scalar_lea.vmem %s251_s13, 128  ;;  %p378_p11 = scmp.lt.s32.totalorder %s251_s13, %s251_s13 }
  0x3b   :  { %p374_p10 = scmp.ne.s32.totalorder %s251_s13, %s373_s14  ;;  %p379_p12 = scmp.lt.s32.totalorder %s373_s14, %s373_s14 }
  0x3c   :  { %277 = vmatmul.mubr.msk.bf16.vlgmr.msra.gmra.mrb[0].mxu0 %vm80_vm1, %v64_v2 }
  0x3d   :  { %288 = vmatprep.mubr.msk.bf16.mxu0 %vm407_vm0, %v406_v0  ;;  %287 = vmatpush3.bf16.msra.mxu0 %v301_v15  ;;  %p380_p13 = por %p379_p12, %p378_p11 }
  0x3f   :  { %p381_p0 = pnand %p380_p13, %p374_p10 }
  0x44   :  { %289 = vmatmul.mubr.msk.bf16.vlgmr.msra.gmra.mrb[4].mxu0 %vm80_vm1, %v64_v2 }
 0x10f   :  { %v118_v4 = vpop.f32.mrb[0].mxu0 }
 0x110   :  { %v119_v5 = vadd.f32 %v260_v3, %v118_v4  ;;  %v278_v6 = vpop.f32.mrb[1].mxu0 }
 0x111   :  { %v121_v7 = vpop.f32.mrb[2].mxu0 }
 0x112   :  { %v279_v8 = vpop.f32.mrb[3].mxu0  ;;  %v124_v9 = vsel %vm80_vm1, %v119_v5, -inf }
 0x113   :  { %125 = vmax.xlane.f32.xlu0 %v124_v9 }
 0x117   :  { %v229_v21 = vpop.f32.mrb[4].mxu0 }
 0x118   :  { %v290_v22 = vpop.f32.mrb[5].mxu0 }
 0x119   :  { %v232_v23 = vpop.f32.mrb[6].mxu0 }
 0x11a   :  { %v291_v24 = vpop.f32.mrb[7].mxu0 }
 0x1a0   :  { %v126_v10 = vpop.xlane.xlu0 %125 }
 0x1a1   :  { %v127_v11 = vsub.f32 %v119_v5, %v126_v10 }
 0x1a3   :  { %v128_v12 = vmul.f32 1.442695, %v127_v11 }
 0x1a5   :  { %303 = vpow2.f32 %v128_v12 }
 0x1af   :  { %v304_v13 = vpop.eup %303 }
 0x1b0   :  { %v130_v14 = vsel %vm80_vm1, %v304_v13, 0.0 }
 0x1b1   :  { %131 = vadd.xlane.f32.xlu0 %v130_v14 }
 0x23e   :  { %v132_v17 = vpop.xlane.xlu0 %131 }
 0x23f   :  { %305 = vrcp.f32 %v132_v17 }
 0x249   :  { %v306_v18 = vpop.eup %305 }
 0x24a   :  { %v134_v19 = vmul.f32 %v306_v18, %v304_v13 }
 0x24c   :  { %v137_v20 = vpack.c.bf16 %v134_v19, %v134_v19 }
 0x24e   :  { %283 = vmatmul.mubr.msk.bf16.vlgmr.msra.gmra.mrb[0].mxu1 %vm80_vm1, %v137_v20 }
 0x321   :  { %v183_v25 = vpop.f32.mrb[0].mxu1 }
 0x322   :  { %v230_v27 = vadd.f32 %v229_v21, %v183_v25  ;;  %v284_v28 = vpop.f32.mrb[1].mxu1 }
 0x323   :  { %v186_v29 = vpop.f32.mrb[2].mxu1 }
 0x324   :  { %v242_v30 = vadd.f32 %v267_v26, %v230_v27  ;;  %v285_v31 = vpop.f32.mrb[3].mxu1 }
 0x326   :  { %243 = vst [vmem:[#allocation8] sm:$0xff] %v242_v30 }
 0x327   :  { %384 = shalt.err (!%p381_p0)
}
 0x328   :  { %s385_s5 = scalar_lea.hbm %s518_s6, 128 }
 0x329   :  { %p386_p1 = scmp.ne.s32.totalorder %s518_s6, %s385_s5  ;;  %p389_p2 = scmp.lt.u32.totalorder %s385_s5, %s518_s6 }
 0x32b   :  { %p391_p3 = pnand %p389_p2, %p386_p1 }
 0x32d   :  { %394 = shalt.err (!%p391_p3)
}
 0x32e   :  { %253 = dma.vmem_to_hbm [thread:$0]  %s251_s13, 128, %s518_s6, [#allocation4]  }
 0x32f   :  { %399 = dma.done.wait [#allocation4], 128  }
 0x330   :  { %400 = vsyncadd [#allocation4], 4294967168 }
 0x331   :  { %257 = vsyncpa [#allocation3], 1 }
 0x332   :  { %258 = vsyncpa [#allocation6], 1 }
 0x333   :  { %259 = vsyncpa [#allocation4], 1 }

</bundles_post_ra>
